<compile_context>
chip_gen: v5e
topology: v5e:2x2
jax: 0.10.0
libtpu: 0.0.40
codegen_flags: <defaults>
</compile_context>

<pallas_src>
import numpy as np
import jax
import jax.numpy as jnp
from jax.experimental import pallas as pl
from jax.experimental.pallas import tpu as pltpu

DROPOUT_P = 0.1


def make_pos_table(d_model: int, max_len: int) -> np.ndarray:
    # Exact replica of the PyTorch __init__ table construction.
    pos_table = np.array(
        [[pos / np.power(10000, 2 * i / d_model) for i in range(d_model)]
         if pos != 0 else np.zeros(d_model)
         for pos in range(max_len)]
    )
    pos_table[1:, 0::2] = np.sin(pos_table[1:, 0::2])
    pos_table[1:, 1::2] = np.cos(pos_table[1:, 1::2])
    return pos_table.astype(np.float32)


def _pe_kernel_eval(x_ref, pos_ref, o_ref):
    # x_ref: (tile_b, tile_s, D); pos_ref: (S, D) resident table slice.
    s = pl.program_id(1)
    tile_s = x_ref.shape[1]
    pos = pos_ref[pl.ds(s * tile_s, tile_s), :]            # (tile_s, D)
    o_ref[...] = (x_ref[...] + pos[None, :, :]).astype(o_ref.dtype)


def _pe_kernel_train(x_ref, pos_ref, u_ref, o_ref):
    # Inverted dropout: keep with prob (1-p), scale survivors by 1/(1-p).
    s = pl.program_id(1)
    tile_s = x_ref.shape[1]
    pos = pos_ref[pl.ds(s * tile_s, tile_s), :]            # (tile_s, D)
    y = x_ref[...] + pos[None, :, :]
    scale = jnp.float32(1.0 / (1.0 - DROPOUT_P))
    keep = (u_ref[...] >= jnp.float32(DROPOUT_P)).astype(jnp.float32)
    o_ref[...] = (y * (keep * scale)).astype(o_ref.dtype)


def _pick_tiles(B, S, D, itemsize, target_block_bytes=4 << 20):
    """Largest (tile_b, tile_s) dividing (B, S) with block <= ~4 MiB.

    tile_s stays a multiple of 8 (sublane constraint) or the full S; D is
    always taken whole (lane-dense last dim)."""
    tile_b, tile_s = B, S

    def block_bytes():
        return tile_b * tile_s * D * itemsize

    while block_bytes() > target_block_bytes and (tile_b % 2 == 0 or tile_s % 16 == 0):
        if tile_b % 2 == 0:
            tile_b //= 2
        else:
            tile_s //= 2   # stays a multiple of 8
    return tile_b, tile_s


def positional_encoding(enc_inputs, pos_table, *, dropout_key=None, training=True):
    """enc_inputs: (B, S, D) f32; pos_table: (max_len, D) f32."""
    B, S, D = enc_inputs.shape
    max_len, Dp = pos_table.shape
    assert Dp == D, "pos_table feature dim mismatch"
    assert S <= max_len, "sequence length exceeds positional-table max_len"

    # Only the rows the forward needs; fetched once (constant block index) and
    # then VMEM-resident for the whole grid.
    pos = pos_table[:S]

    itemsize = jnp.dtype(enc_inputs.dtype).itemsize
    tile_b, tile_s = _pick_tiles(B, S, D, itemsize)
    assert B % tile_b == 0 and S % tile_s == 0
    grid = (B // tile_b, S // tile_s)

    x_spec = pl.BlockSpec((tile_b, tile_s, D), lambda b, s: (b, s, 0))
    pos_spec = pl.BlockSpec((S, D), lambda b, s: (0, 0))     # resident, DMA'd once
    out_spec = pl.BlockSpec((tile_b, tile_s, D), lambda b, s: (b, s, 0))

    block_bytes = tile_b * tile_s * D * itemsize
    n_streamed = 3 if training else 2                        # x (+ uniforms) + out
    vmem_needed = n_streamed * 2 * block_bytes + S * D * 4 + (2 << 20)
    compiler_params = pltpu.CompilerParams(
        dimension_semantics=("parallel", "parallel"),
        vmem_limit_bytes=int(max(vmem_needed, 16 << 20)),
    )

    if not training:
        return pl.pallas_call(
            _pe_kernel_eval,
            out_shape=jax.ShapeDtypeStruct((B, S, D), enc_inputs.dtype),
            grid=grid,
            in_specs=[x_spec, pos_spec],
            out_specs=out_spec,
            compiler_params=compiler_params,
        )(enc_inputs, pos)

    if dropout_key is None:
        dropout_key = jax.random.PRNGKey(0)
    # TODO(synk): on real TPU hardware the dropout bits could be generated
    # in-kernel with pltpu.prng_seed / pltpu.prng_random_bits (saves one HBM
    # read stream); kept host-side so the kernel also lowers under interpret.
    u = jax.random.uniform(dropout_key, (B, S, D), dtype=jnp.float32)

    return pl.pallas_call(
        _pe_kernel_train,
        out_shape=jax.ShapeDtypeStruct((B, S, D), enc_inputs.dtype),
        grid=grid,
        in_specs=[x_spec, pos_spec, x_spec],
        out_specs=out_spec,
        compiler_params=compiler_params,
    )(enc_inputs, pos, u)


if __name__ == "__main__":
    D_MODEL = 128          # small, lane-aligned stand-in for the module's 512
    MAX_LEN = 64
    B, S = 2, 8

    key = jax.random.PRNGKey(0)
    x_key, drop_key = jax.random.split(key)
    x = jax.random.normal(x_key, (B, S, D_MODEL), dtype=jnp.float32)
    pos_table = jnp.asarray(make_pos_table(D_MODEL, MAX_LEN))

    # Eval mode (dropout is identity) — check against plain JAX reference.
    out_eval = jax.block_until_ready(
        positional_encoding(x, pos_table, training=False))
    ref_eval = x + pos_table[:S][None, :, :]
    np.testing.assert_allclose(np.asarray(out_eval), np.asarray(ref_eval),
                               rtol=1e-6, atol=1e-6)

    # Training mode — uniforms are deterministic, so the reference is exact.
    out_train = jax.block_until_ready(
        positional_encoding(x, pos_table, dropout_key=drop_key, training=True))
    u = jax.random.uniform(drop_key, (B, S, D_MODEL), dtype=jnp.float32)
    ref_train = jnp.where(u >= DROPOUT_P, ref_eval / (1.0 - DROPOUT_P), 0.0)
    np.testing.assert_allclose(np.asarray(out_train), np.asarray(ref_train),
                               rtol=1e-5, atol=1e-5)

    print("KERNEL_OK")
</pallas_src>

<mosaic_0001>
module attributes {stable_mosaic.version = 11 : i64} {
  func.func @_pe_kernel_eval(%arg0: i32, %arg1: i32, %arg2: memref<2x8x128xf32, #tpu.memory_space<vmem>>, %arg3: memref<8x128xf32, #tpu.memory_space<vmem>>, %arg4: memref<2x8x128xf32, #tpu.memory_space<vmem>>) attributes {dimension_semantics = [#tpu.dimension_semantics<parallel>, #tpu.dimension_semantics<parallel>], iteration_bounds = array<i64: 1, 1>, scalar_prefetch = 0 : i64, scratch_operands = 0 : i64, tpu.core_type = #tpu.core_type<tc>, window_params = [{transform_indices = @transform_0, window_bounds = array<i64: 2, 8, 128>}, {pipeline_mode = #tpu.pipeline_mode<synchronous>, transform_indices = @transform_1, window_bounds = array<i64: 8, 128>}, {transform_indices = @transform_2, window_bounds = array<i64: 2, 8, 128>}]} {
    %c8_i32 = arith.constant 8 : i32
    %0 = arith.muli %arg1, %c8_i32 : i32
    %1 = arith.index_cast %0 : i32 to index
    %c0 = arith.constant 0 : index
    %2 = vector.load %arg3[%1, %c0] : memref<8x128xf32, #tpu.memory_space<vmem>>, vector<8x128xf32>
    %c0_0 = arith.constant 0 : index
    %c0_1 = arith.constant 0 : index
    %c0_2 = arith.constant 0 : index
    %3 = vector.load %arg2[%c0_0, %c0_1, %c0_2] : memref<2x8x128xf32, #tpu.memory_space<vmem>>, vector<2x8x128xf32>
    %4 = vector.shape_cast %2 : vector<8x128xf32> to vector<1x8x128xf32>
    %5 = vector.broadcast %4 : vector<1x8x128xf32> to vector<2x8x128xf32>
    %6 = arith.addf %3, %5 : vector<2x8x128xf32>
    %c0_3 = arith.constant 0 : index
    %c0_4 = arith.constant 0 : index
    %c0_5 = arith.constant 0 : index
    %7 = vector.load %arg4[%c0_3, %c0_4, %c0_5] : memref<2x8x128xf32, #tpu.memory_space<vmem>>, vector<2x8x128xf32>
    tpu.vector_store %arg4[%c0_3, %c0_4, %c0_5], %6 {strides = array<i32>} : memref<2x8x128xf32, #tpu.memory_space<vmem>>, vector<2x8x128xf32>,
    return
  }
  func.func @transform_0(%arg0: i32, %arg1: i32) -> (i32, i32, i32) {
    %c0_i32 = arith.constant 0 : i32
    %c0_i32_0 = arith.constant 0 : i32
    return %arg0, %arg1, %c0_i32 : i32, i32, i32
  }
  func.func @transform_1(%arg0: i32, %arg1: i32) -> (i32, i32) {
    %c0_i32 = arith.constant 0 : i32
    %c0_i32_0 = arith.constant 0 : i32
    %c0_i32_1 = arith.constant 0 : i32
    return %c0_i32, %c0_i32_0 : i32, i32
  }
  func.func @transform_2(%arg0: i32, %arg1: i32) -> (i32, i32, i32) {
    %c0_i32 = arith.constant 0 : i32
    %c0_i32_0 = arith.constant 0 : i32
    return %arg0, %arg1, %c0_i32 : i32, i32, i32
  }
}

</mosaic_0001>

<bundles_post_ra>
// kernel: tpu_custom_call.1
= control target key start
LH: loop header
LB: loop body
LE: loop exit
PB: predicated region body
PF: predicated region fallthrough
CT: control target
= control target key end

     0   :  { %7 = vsyncpa [#allocation3], 0  ;;  %s183_s0 = inlined_call_operand.hbm [shape: f32[2,8,128], index: 0, kind: input, shape index: {}]   ;;  %s184_s1 = inlined_call_operand.hbm [shape: f32[8,128], index: 1, kind: input, shape index: {}]   ;;  %s185_s2 = inlined_call_operand.hbm [shape: f32[2,8,128], index: 2, kind: output, shape index: {}]  }
   0x1   :  { %8 = vsyncpa [#allocation6], 0 }
   0x2   :  { %9 = vsyncpa [#allocation4], 0  ;;  %s14_s11 = sshll.u32 %s183_s0, 4  ;;  %s154_s12 = smov [#allocation2]   ;;  %s15_s11 = int_to_ptr.hbm [resolvable:$true] %s14_s11 }
   0x3   :  { %s16_s13 = sshll.u32 %s154_s12, 4  ;;  %s28_s16 = sshll.u32 %s184_s1, 4  ;;  %s17_s13 = int_to_ptr.vmem [resolvable:$true] %s16_s13  ;;  %s29_s16 = int_to_ptr.hbm [resolvable:$true] %s28_s16 }
   0x4   :  { %s155_s17 = smov 128   ;;  %s156_s18 = smov 8  }
   0x5   :  { %22 = dma.hbm_to_vmem [thread:$0]  %s15_s11, 256, %s17_s13, [#allocation3], %s155_s17, %s155_s17, %s156_s18  }
   0x6   :  { %s157_s19 = smov [#allocation5]  }
   0x7   :  { %s30_s20 = sshll.u32 %s157_s19, 4  ;;  %s31_s20 = int_to_ptr.vmem [resolvable:$true] %s30_s20 }
   0x8   :  { %33 = dma.hbm_to_vmem [thread:$0]  %s29_s16, 128, %s31_s20, [#allocation6]  }
   0x9   :  { %148 = dma.done.wait [#allocation3], 256  }
   0xa   :  { %149 = vsyncadd [#allocation3], 4294967040 }
   0xb   :  { %150 = dma.done.wait [#allocation6], 128  }
   0xc   :  { %151 = vsyncadd [#allocation6], 4294967168  ;;  %s158_s0 = smov [#allocation7]   ;;  %s57_s24 = sshll.u32 %s185_s2, 4  ;;  %v44_v0 = vld [vmem:[#allocation5] sm:$0xff]  ;;  %v45_v1 = vld [vmem:[#allocation2] sm:$0xff]  ;;  %s58_s24 = int_to_ptr.hbm [resolvable:$true] %s57_s24 }
   0xd   :  { %s55_s21 = sshll.u32 %s158_s0, 4  ;;  %v46_v2 = vld [vmem:[#allocation2 + $0x8] sm:$0xff]  ;;  %v47_v3 = vadd.f32 %v45_v1, %v44_v0  ;;  %s56_s21 = int_to_ptr.vmem [resolvable:$true] %s55_s21 }
   0xe   :  { %v48_v4 = vadd.f32 %v46_v2, %v44_v0 }
   0xf   :  { %49 = vst [vmem:[#allocation7] sm:$0xff] %v47_v3 }
  0x10   :  { %50 = vst [vmem:[#allocation7 + $0x8] sm:$0xff] %v48_v4 }
  0x11   :  { %63 = dma.vmem_to_hbm [thread:$0]  %s56_s21, 256, %s58_s24, [#allocation4], %s155_s17, %s155_s17, %s156_s18  }
  0x12   :  { %152 = dma.done.wait [#allocation4], 256  }
  0x13   :  { %153 = vsyncadd [#allocation4], 4294967040 }
  0x14   :  { %68 = vsyncpa [#allocation3], 1 }
  0x15   :  { %69 = vsyncpa [#allocation6], 1 }
  0x16   :  { %70 = vsyncpa [#allocation4], 1 }

</bundles_post_ra>
